<compile_context>
chip_gen: v7x
topology: tpu7x:2x2x1
jax: 0.10.0
libtpu: 0.0.40
codegen_flags: <defaults>
</compile_context>

<pallas_src>
from typing import NamedTuple

import jax
import jax.numpy as jnp
from jax import lax
from jax.experimental import pallas as pl
from jax.experimental.pallas import tpu as pltpu

POS_EMBED_SIZE = 100

_LANE = 128
_SUBLANE = 8
_INV_SQRT2 = 0.7071067811865476


def _round_up(a, b):
    return ((a + b - 1) // b) * b


def _cdiv(a, b):
    return -(-a // b)


def _pick_tile(dim, target):
    """Pick a 128-multiple tile near `target` and a zero-padded dim that is an
    exact multiple of it.  Awkward dims (no nice divisor) are padded up a
    little instead of falling back to tiny 128-wide tiles."""
    padded = _round_up(max(dim, 1), _LANE)
    n_blocks = _cdiv(padded, target)
    tile = _round_up(_cdiv(padded, n_blocks), _LANE)
    return tile, tile * n_blocks


def _device_profile():
    """Per-generation tile targets and VMEM cap (conservative fallback)."""
    vmem = 64 << 20
    try:
        vmem = int(getattr(pltpu.get_tpu_info(), "vmem_capacity_bytes", vmem))
    except Exception:
        pass
    if vmem >= (96 << 20):       # v5e / v6e: 128 MiB physical VMEM
        return {"tm_target": 512, "tn_target": 1024, "tk_target": 1024,
                "vmem_cap": 96 << 20}
    # v7x (64 MiB per TC) or unknown: portable tiles, compiler headroom kept.
    return {"tm_target": 512, "tn_target": 512, "tk_target": 512,
            "vmem_cap": 48 << 20}


class MLPParams(NamedTuple):
    w: jax.Array       # [d_in_p, d_out_p]  compute dtype, lane-aligned, zero-padded
    b: jax.Array       # [1, d_out_p]       float32, zero-padded
    d_in: int
    d_out: int
    tk: int
    tn: int


def prepare_mlp_params(weight, bias, *, compute_dtype=jnp.bfloat16,
                       tn_target=None, tk_target=None, min_j_blocks=2):
    """Pad / transpose / cast the Linear parameters ONCE (hoist out of the
    hot forward path).  weight: [d_out, d_in] (PyTorch layout), bias: [d_out]."""
    prof = _device_profile()
    tn_target = prof["tn_target"] if tn_target is None else tn_target
    tk_target = prof["tk_target"] if tk_target is None else tk_target

    d_out, d_in = weight.shape
    tk, d_in_p = _pick_tile(d_in, tk_target)
    tn, d_out_p = _pick_tile(d_out, tn_target)

    # v7x megacore: keep >= min_j_blocks blocks along the j "parallel" axis so
    # both TensorCores get work even when the row grid collapses to one block
    # in the small-N serving regime.  Near-free on single-TC v5e/v6e.
    if (min_j_blocks > 1 and d_out_p // tn < min_j_blocks
            and d_out_p >= min_j_blocks * _LANE):
        tn = _round_up(_cdiv(d_out_p, min_j_blocks), _LANE)
        d_out_p = tn * _cdiv(d_out_p, tn)

    w = jnp.asarray(weight).T.astype(compute_dtype)          # [d_in, d_out]
    if (d_in_p, d_out_p) != (d_in, d_out):
        w = jnp.pad(w, ((0, d_in_p - d_in), (0, d_out_p - d_out)))
    b = jnp.asarray(bias, dtype=jnp.float32).reshape(1, d_out)
    if d_out_p != d_out:
        b = jnp.pad(b, ((0, 0), (0, d_out_p - d_out)))
    return MLPParams(w=w, b=b, d_in=d_in, d_out=d_out, tk=tk, tn=tn)


def _gelu_exact(y):
    # exact GELU: 0.5 * y * (1 + erf(y / sqrt(2)))  (torch.nn.GELU default)
    return 0.5 * y * (1.0 + lax.erf(y * jnp.float32(_INV_SQRT2)))


def _mlp_kernel_fused(x_ref, w_ref, b_ref, o_ref):
    """Single-K-block fast path: fused matmul + bias + exact GELU.
    No accumulator scratch, no pl.when branches."""
    y = jnp.dot(x_ref[...], w_ref[...], preferred_element_type=jnp.float32)
    y = y + b_ref[...]
    # TODO(synk): nn.Dropout is identity in eval mode; training-mode masking
    # (pltpu.prng_seed + stateful_bernoulli) intentionally not applied here.
    o_ref[...] = _gelu_exact(y).astype(o_ref.dtype)


def _mlp_kernel_acc(x_ref, w_ref, b_ref, o_ref, acc_ref):
    """Multi-K-block path: f32 accumulator, bias+GELU fused at finalize."""
    k = pl.program_id(2)

    @pl.when(k == 0)
    def _():
        acc_ref[...] = jnp.zeros_like(acc_ref)

    acc_ref[...] += jnp.dot(x_ref[...], w_ref[...],
                            preferred_element_type=jnp.float32)

    @pl.when(k == pl.num_programs(2) - 1)
    def _():
        y = acc_ref[...] + b_ref[...]
        o_ref[...] = _gelu_exact(y).astype(o_ref.dtype)


def mlp_forward(x, params: MLPParams, *, tm=None):
    """x: [..., d_in]; params: MLPParams from prepare_mlp_params()."""
    orig_shape = x.shape
    d_in, d_out = params.d_in, params.d_out
    assert orig_shape[-1] == d_in, (orig_shape, d_in)
    out_dtype = x.dtype
    compute_dtype = params.w.dtype
    tk, tn = params.tk, params.tn
    d_in_p, d_out_p = params.w.shape

    x2 = x.reshape(-1, d_in)
    n = x2.shape[0]

    prof = _device_profile()
    if tm is None:
        n_pad8 = _round_up(max(n, 1), _SUBLANE)
        if n_pad8 <= prof["tm_target"]:
            tm = n_pad8               # small-N serving/parser regime: 1 row block
        else:
            tm = prof["tm_target"]
    else:
        tm = _round_up(max(tm, 1), _SUBLANE)
    n_p = _round_up(max(n, 1), tm)

    # Per-call padding / cast of the (small) activation only; the weight was
    # padded and cast once in prepare_mlp_params.
    if (n_p, d_in_p) != (n, d_in):
        x2 = jnp.pad(x2, ((0, n_p - n), (0, d_in_p - d_in)))
    if x2.dtype != compute_dtype:
        x2 = x2.astype(compute_dtype)

    grid_i = n_p // tm
    grid_j = d_out_p // tn
    grid_k = d_in_p // tk

    # VMEM budget: double-buffered x / W / out tiles (+ f32 acc, sublane-padded
    # bias), capped per generation so v7x keeps compiler headroom.
    in_b = jnp.dtype(compute_dtype).itemsize
    o_b = jnp.dtype(out_dtype).itemsize
    est = (2 * tm * tk * in_b + 2 * tk * tn * in_b + 2 * tm * tn * o_b
           + 2 * _SUBLANE * tn * 4)
    if grid_k > 1:
        est += tm * tn * 4
    vmem_limit = int(min(max(2 * est, 32 << 20), prof["vmem_cap"]))

    if grid_k == 1:
        out = pl.pallas_call(
            _mlp_kernel_fused,
            out_shape=jax.ShapeDtypeStruct((n_p, d_out_p), out_dtype),
            grid_spec=pltpu.PrefetchScalarGridSpec(
                num_scalar_prefetch=0,
                grid=(grid_i, grid_j),
                in_specs=[
                    pl.BlockSpec((tm, tk), lambda i, j: (i, 0)),   # x tile
                    pl.BlockSpec((tk, tn), lambda i, j: (0, j)),   # W^T tile
                    pl.BlockSpec((1, tn), lambda i, j: (0, j)),    # bias tile
                ],
                out_specs=pl.BlockSpec((tm, tn), lambda i, j: (i, j)),
            ),
            compiler_params=pltpu.CompilerParams(
                dimension_semantics=("parallel", "parallel"),
                vmem_limit_bytes=vmem_limit,
            ),
        )(x2, params.w, params.b)
    else:
        out = pl.pallas_call(
            _mlp_kernel_acc,
            out_shape=jax.ShapeDtypeStruct((n_p, d_out_p), out_dtype),
            grid_spec=pltpu.PrefetchScalarGridSpec(
                num_scalar_prefetch=0,
                grid=(grid_i, grid_j, grid_k),
                in_specs=[
                    pl.BlockSpec((tm, tk), lambda i, j, k: (i, k)),   # x tile
                    pl.BlockSpec((tk, tn), lambda i, j, k: (k, j)),   # W^T tile
                    pl.BlockSpec((1, tn), lambda i, j, k: (0, j)),    # bias tile
                ],
                out_specs=pl.BlockSpec((tm, tn), lambda i, j, k: (i, j)),
                scratch_shapes=[pltpu.VMEM((tm, tn), jnp.float32)],
            ),
            compiler_params=pltpu.CompilerParams(
                dimension_semantics=("parallel", "parallel", "arbitrary"),
                vmem_limit_bytes=vmem_limit,
            ),
        )(x2, params.w, params.b)

    if (n_p, d_out_p) != (n, d_out):
        # Negligible for the parser shapes; keep the padded layout downstream
        # if d_out is large and the consumer can handle it.
        out = out[:n, :d_out]
    return out.reshape(*orig_shape[:-1], d_out)


def mlp_forward_raw(x, weight, bias, **prepare_kwargs):
    """Convenience one-off path.  In real use, hoist prepare_mlp_params() so
    the weight is padded / cast only once, not every forward call."""
    return mlp_forward(x, prepare_mlp_params(weight, bias, **prepare_kwargs))


def init_mlp_params(key, hidden_size, output_size, dtype=jnp.float32):
    """Mirror reset_parameters(): orthogonal_ weight [out, in], zero bias."""
    d_in = hidden_size + POS_EMBED_SIZE
    a = jax.random.normal(key, (output_size, d_in), dtype=jnp.float32)
    if output_size <= d_in:
        q, r = jnp.linalg.qr(a.T)          # q: [d_in, output_size]
        q = q * jnp.sign(jnp.diag(r))
        weight = q.T
    else:
        q, r = jnp.linalg.qr(a)
        q = q * jnp.sign(jnp.diag(r))
        weight = q
    bias = jnp.zeros((output_size,), dtype=dtype)
    return weight.astype(dtype), bias


def reference_forward(x, weight, bias):
    y = x @ weight.T + bias
    return jax.nn.gelu(y, approximate=False)


if __name__ == "__main__":
    key = jax.random.PRNGKey(0)
    k_x, k_w, k_b = jax.random.split(key, 3)

    # Dependency-parser-like shapes with UN-aligned feature dims:
    # hidden_size=32 -> D_in = 32 + 100 = 132, output_size=200, N = 2*8 = 16.
    batch, seq, hidden_size, output_size = 2, 8, 32, 200
    d_in = hidden_size + POS_EMBED_SIZE

    x = jax.random.normal(k_x, (batch, seq, d_in), dtype=jnp.float32)
    weight, bias0 = init_mlp_params(k_w, hidden_size, output_size)
    bias = 0.1 * jax.random.normal(k_b, (output_size,), dtype=jnp.float32)

    ref = reference_forward(x, weight, bias)

    # 1) Default serving path: bf16 pre-padded weight (prepared once), single
    #    K block -> fused matmul + bias + exact GELU, >=2 j-blocks for v7x.
    params_bf16 = prepare_mlp_params(weight, bias)          # hoisted, one time
    out = jax.block_until_ready(mlp_forward(x, params_bf16))
    assert out.shape == (batch, seq, output_size)
    assert jnp.allclose(out, ref, atol=6e-2, rtol=5e-2), float(
        jnp.max(jnp.abs(out - ref)))

    # 2) f32 path with small tiles forcing the multi-K accumulation kernel and
    #    a multi-block (i, j) grid; tight tolerance vs the reference.
    params_f32 = prepare_mlp_params(weight, bias, compute_dtype=jnp.float32,
                                    tn_target=128, tk_target=128)
    out2 = jax.block_until_ready(mlp_forward(x, params_f32, tm=8))
    assert jnp.allclose(out2, ref, atol=1e-5, rtol=1e-5), float(
        jnp.max(jnp.abs(out2 - ref)))

    print("KERNEL_OK")
</pallas_src>

<mosaic_0001>
module attributes {stable_mosaic.version = 11 : i64} {
  func.func @_mlp_kernel_fused(%arg0: i32, %arg1: i32, %arg2: memref<16x256xbf16, #tpu.memory_space<vmem>>, %arg3: memref<256x128xbf16, #tpu.memory_space<vmem>>, %arg4: memref<1x128xf32, #tpu.memory_space<vmem>>, %arg5: memref<16x128xf32, #tpu.memory_space<vmem>>) attributes {dimension_semantics = [#tpu.dimension_semantics<parallel>, #tpu.dimension_semantics<parallel>], iteration_bounds = array<i64: 1, 2>, scalar_prefetch = 0 : i64, scratch_operands = 0 : i64, tpu.core_type = #tpu.core_type<tc>, window_params = [{transform_indices = @transform_0, window_bounds = array<i64: 16, 256>}, {transform_indices = @transform_1, window_bounds = array<i64: 256, 128>}, {transform_indices = @transform_2, window_bounds = array<i64: 1, 128>}, {transform_indices = @transform_3, window_bounds = array<i64: 16, 128>}]} {
    %c0 = arith.constant 0 : index
    %c0_0 = arith.constant 0 : index
    %0 = vector.load %arg2[%c0, %c0_0] : memref<16x256xbf16, #tpu.memory_space<vmem>>, vector<16x256xbf16>
    %c0_1 = arith.constant 0 : index
    %c0_2 = arith.constant 0 : index
    %1 = vector.load %arg3[%c0_1, %c0_2] : memref<256x128xbf16, #tpu.memory_space<vmem>>, vector<256x128xbf16>
    %cst = arith.constant dense<0.000000e+00> : vector<16x128xf32>
    %2 = tpu.matmul %0, %1, %cst {dimension_numbers = #tpu.dot_dimension_numbers<[1], [0], [0], [1], [0, 0, 1, 1], [], []>} : vector<16x256xbf16>, vector<256x128xbf16>, vector<16x128xf32> -> vector<16x128xf32>
    %c0_3 = arith.constant 0 : index
    %c0_4 = arith.constant 0 : index
    %3 = vector.load %arg4[%c0_3, %c0_4] : memref<1x128xf32, #tpu.memory_space<vmem>>, vector<1x128xf32>
    %4 = vector.broadcast %3 : vector<1x128xf32> to vector<16x128xf32>
    %5 = arith.addf %2, %4 : vector<16x128xf32>
    %cst_5 = arith.constant 5.000000e-01 : f32
    %6 = vector.broadcast %cst_5 : f32 to vector<16x128xf32>
    %7 = arith.mulf %6, %5 : vector<16x128xf32>
    %cst_6 = arith.constant 0.707106769 : f32
    %8 = vector.broadcast %cst_6 : f32 to vector<16x128xf32>
    %9 = arith.mulf %5, %8 : vector<16x128xf32>
    %10 = math.erf %9 : vector<16x128xf32>
    %cst_7 = arith.constant 1.000000e+00 : f32
    %11 = vector.broadcast %cst_7 : f32 to vector<16x128xf32>
    %12 = arith.addf %11, %10 : vector<16x128xf32>
    %13 = arith.mulf %7, %12 : vector<16x128xf32>
    %c0_8 = arith.constant 0 : index
    %c0_9 = arith.constant 0 : index
    %14 = vector.load %arg5[%c0_8, %c0_9] : memref<16x128xf32, #tpu.memory_space<vmem>>, vector<16x128xf32>
    tpu.vector_store %arg5[%c0_8, %c0_9], %13 {strides = array<i32>} : memref<16x128xf32, #tpu.memory_space<vmem>>, vector<16x128xf32>,
    return
  }
  func.func @transform_0(%arg0: i32, %arg1: i32) -> (i32, i32) {
    %c0_i32 = arith.constant 0 : i32
    %c0_i32_0 = arith.constant 0 : i32
    return %arg0, %c0_i32 : i32, i32
  }
  func.func @transform_1(%arg0: i32, %arg1: i32) -> (i32, i32) {
    %c0_i32 = arith.constant 0 : i32
    %c0_i32_0 = arith.constant 0 : i32
    return %c0_i32, %arg1 : i32, i32
  }
  func.func @transform_2(%arg0: i32, %arg1: i32) -> (i32, i32) {
    %c0_i32 = arith.constant 0 : i32
    %c0_i32_0 = arith.constant 0 : i32
    return %c0_i32, %arg1 : i32, i32
  }
  func.func @transform_3(%arg0: i32, %arg1: i32) -> (i32, i32) {
    %c0_i32 = arith.constant 0 : i32
    return %arg0, %arg1 : i32, i32
  }
}

</mosaic_0001>

<bundles_post_ra>
// kernel: tpu_custom_call.1
= control target key start
LH: loop header
LB: loop body
LE: loop exit
PB: predicated region body
PF: predicated region fallthrough
CT: control target
= control target key end

     0   :  { %8 = vsyncpa [#allocation3], 0  ;;  %s1147_s0 = inlined_call_operand.hbm [shape: bf16[16,256], index: 0, kind: input, shape index: {}]   ;;  %s1148_s1 = inlined_call_operand.hbm [shape: bf16[256,256], index: 1, kind: input, shape index: {}]   ;;  %s1149_s2 = inlined_call_operand.vmem [shape: f32[1,256], index: 2, kind: input, shape index: {}]   ;;  %s1150_s3 = inlined_call_operand.hbm [shape: f32[16,256], index: 3, kind: output, shape index: {}]  }
   0x1   :  { %9 = vsyncpa [#allocation6], 0 }
   0x2   :  { %11 = vsyncpa [#allocation6 + $0x1], 0 }
   0x3   :  { %12 = vsyncpa [#allocation4], 0 }
   0x4   :  { %14 = vsyncpa [#allocation4 + $0x1], 0  ;;  %s900_s12 = smov 0   ;;  %s902_s13 = smov 0  }
   0x5   :  { %s904_s14 = smov 0   ;;  %s906_s15 = smov 0  }
   0x6   :  { %s908_s16 = smov 0   ;;  %s910_s17 = smov 0  }
   0x7 LB: > { %s565_s18 = sadd.s32 4294967295, %s868_s17   ;;  %s566_s19 = sadd.s32 4294967294, %s868_s17   ;;  %s868_s17 = sphi %s910_s17, %s20_s17   ;;  %s864_s16 = sphi %s908_s16, %s1176_s16   ;;  %s860_s15 = sphi %s906_s15, %s1175_s15   ;;  %s856_s14 = sphi %s904_s14, %s1174_s14   ;;  %s852_s13 = sphi %s902_s13, %s1173_s13   ;;  %s848_s12 = sphi %s900_s12, %s1172_s12  }
   0x8   : > { %p72_p0 = scmp.ne.s32.totalorder %s856_s14, %s852_s13  ;;  %p73_p1 = scmp.eq.s32.totalorder %s868_s17, 0 }
   0x9   : > { %p78_p2 = scmp.ne.s32.totalorder %s852_s13, %s848_s12  ;;  %p937_p3 = scmp.eq.s32.totalorder %s565_s18, 0 }
   0xa   : > { %p941_p4 = por %p73_p1, %p72_p0  ;;  %p130_p5 = scmp.eq.s32.totalorder %s565_s18, 1 }
   0xb   : > { %s1157_s20 = scalar_select %p937_p3, 1, 0 }
   0xc   : > { %p947_p6 = por %p937_p3, %p78_p2  ;;  %p136_p7 = scmp.eq.s32.totalorder %s566_s19, 1 }
   0xd   : > { %p951_p8 = por %p130_p5, %p72_p0  ;;  %p567_p9 = scmp.ge.s32.totalorder %s868_s17, 1 }
   0xe   : > { %s1159_s22 = scalar_select %p947_p6, 1, 0 }
   0xf   : > { %s1160_s23 = scalar_select %p951_p8, 1, 0 }
  0x10   : > { %p956_p10 = por %p136_p7, %p78_p2  ;;  %p143_p11 = scmp.lt.s32.totalorder %s868_s17, 3 }
  0x11   : > { %s870_s26 = smov [#allocation2]   ;;  %p642_p1 = scmp.lt.s32.totalorder %s868_s17, 2 }
  0x12   : > { %s1161_s24 = scalar_select %p956_p10, 1, 0 }
  0x13   : > { %p961_p12 = pnand %p567_p9, %p143_p11  ;;  %s159_s27 = sshll.u32 %s870_s26, 4  ;;  %s965_s27 = int_to_ptr.vmem [resolvable:$true] %s159_s27 }
  0x14   : > { %p979_p2 = pnand %p642_p1, %p941_p4  ;;  %s29_s30 = sadd.s32 1, %s864_s16 }
  0x15   : > { %s1162_s25 = scalar_select %p961_p12, 1, 0 }
  0x16   : > { %p629_p13 = pneg %p961_p12  ;;  %s724_s6 = scalar_lea.hbm %s1147_s0, 256 }
  0x17   : > { %s1164_s29 = scalar_select %p979_p2, 1, 0 }
  0x18   : > { %p973_p5 = pnand %p629_p13, %p937_p3  ;;  %p725_p7 = scmp.ne.s32.totalorder %s1147_s0, %s724_s6 }
  0x19   : > { %p731_p4 = scmp.lt.u32.totalorder %s724_s6, %s1147_s0 }
  0x1a   : > { %p726_p9 = pneg %p973_p5 }
  0x1c   : > { %p727_p11 = pnand %p726_p9, %p725_p7 }
  0x1e   : > { %p728_p13 = pneg %p727_p11 }
  0x20   : > { %p733_p1 = pnand %p731_p4, %p728_p13 }
  0x22   : > { %736 = shalt.err (!%p733_p1)
}
  0x23   : > { %s737_s11 = scalar_lea.vmem %s965_s27, 256  ;;  %p745_p6 = scmp.lt.s32.totalorder %s965_s27, %s965_s27 }
  0x24   : > { %p738_p0 = scmp.ne.s32.totalorder %s965_s27, %s737_s11  ;;  %p746_p3 = scmp.lt.s32.totalorder %s737_s11, %s737_s11 }
  0x26   : > { %p740_p10 = pnand %p738_p0, %p726_p9  ;;  %p747_p12 = por %p746_p3, %p745_p6 }
  0x28   : > { %p741_p8 = pneg %p740_p10 }
  0x2a   : > { %p748_p2 = pnand %p747_p12, %p741_p8 }
  0x2c   : > { %751 = shalt.err (!%p748_p2)
}
  0x2d   : > { %s871_s18 = smov 128   ;;  %s872_s19 = smov 8  }
  0x2e   : > { %632 = dma.hbm_to_vmem [thread:$0]  (!%p973_p5), %s1147_s0, 256, %s965_s27, [#allocation3], %s871_s18, %s871_s18, %s872_s19  }
  0x2f   : > { %p30_p10 = scmp.ge.s32.totalorder %s29_s30, 2  ;;  %s65_s4 = sadd.s32 1, %s856_s14 }
  0x30   : > { %s173_s5 = sand.u32 1, %s856_s14   ;;  %s571_s8 = sshll.u32 %s864_s16, 6 }
  0x31   : > { %s1178_s30 = smov (%p30_p10, %s29_s30), 0  ;;  %s570_s6 = sshll.u32 %s173_s5, 7 }
  0x32   : > { %s62_s7 = ssub.s32 %s864_s16, %s1178_s30  ;;  %s1017_s10 = scalar_lea.hbm %s1148_s1, %s571_s8 }
  0x33   : > { %p63_p3 = scmp.eq.s32.totalorder %s62_s7, 0  ;;  %s177_s27 = scalar_lea.vmem [#allocation5], %s570_s6 }
  0x34   : > { %s183_s11 = sshll.u32 %s177_s27, 4  ;;  %s1024_s21 = scalar_lea.sflag [#allocation6], %s173_s5  ;;  %s1022_s11 = int_to_ptr.vmem [resolvable:$true] %s183_s11 }
  0x35   : > { %s1020_s19 = scalar_select %p63_p3, %s856_s14, %s65_s4  }
  0x36   : > { %s752_s26 = scalar_lea.hbm %s1017_s10, 2048  ;;  %p1165_p8 = scmp.ne.s32.totalorder %s1164_s29, 0 }
  0x37   : > { %p753_p6 = scmp.ne.s32.totalorder %s1017_s10, %s752_s26  ;;  %s757_s9 = scalar_lea.hbm %s1148_s1, 4096 }
  0x38   : > { %p754_p12 = pneg %p1165_p8  ;;  %p758_p2 = scmp.lt.u32.totalorder %s1017_s10, %s1148_s1 }
  0x39   : > { %p759_p7 = scmp.lt.u32.totalorder %s757_s9, %s752_s26  ;;  %p761_p11 = scmp.lt.u32.totalorder %s752_s26, %s1017_s10 }
  0x3a   : > { %p755_p0 = pnand %p754_p12, %p753_p6 }
  0x3b   : > { %p760_p9 = por %p759_p7, %p758_p2 }
  0x3c   : > { %p756_p5 = pneg %p755_p0 }
  0x3d   : > { %p762_p13 = por %p761_p11, %p760_p9 }
  0x3f   : > { %p763_p4 = pnand %p762_p13, %p756_p5 }
  0x41   : > { %766 = shalt.err (!%p763_p4)
}
  0x42   : > { %s767_s4 = scalar_lea.vmem %s1022_s11, 2048  ;;  %s873_s5 = smov [#allocation5]  }
  0x43   : > { %p768_p1 = scmp.ne.s32.totalorder %s1022_s11, %s767_s4  ;;  %s772_s27 = sshll.u32 %s873_s5, 4  ;;  %s773_s27 = int_to_ptr.vmem [resolvable:$false] %s772_s27 }
  0x44   : > { %s774_s7 = scalar_lea.vmem %s773_s27, 4096  ;;  %p775_p6 = scmp.lt.s32.totalorder %s1022_s11, %s773_s27 }
  0x45   : > { %p770_p10 = pnand %p768_p1, %p754_p12  ;;  %p776_p0 = scmp.lt.s32.totalorder %s774_s7, %s767_s4 }
  0x47   : > { %p771_p3 = pneg %p770_p10  ;;  %p777_p2 = por %p776_p0, %p775_p6 }
  0x49   : > { %p778_p7 = pnand %p777_p2, %p771_p3 }
  0x4b   : > { %781 = shalt.err (!%p778_p7)
}
  0x4c   : > { %s874_s26 = smov 64   ;;  %s875_s8 = smov 4  }
  0x4d   : > { %636 = dma.hbm_to_vmem [thread:$0]  (!%p1165_p8), %s1017_s10, 2048, %s1022_s11, %s1024_s21, %s871_s18, %s874_s26, %s875_s8  }
  0x4e   : > { %p1166_p12 = scmp.ne.s32.totalorder %s1162_s25, 0 }
  0x4f   : > { %p1167_p5 = scmp.ne.s32.totalorder (!%p1166_p12), %s1157_s20, 0 }
  0x50   : > { %201 = sbr.rel (%p1166_p12) target bundleno = 377 (0x179), region = 32 }
  0x57   : > { %835 = dma.done.wait (%p1167_p5), [#allocation3], 256  }
  0x58   : > { %837 = vsyncadd (%p1167_p5), [#allocation3], 4294967040  ;;  %s1060_s9 = sand.u32 1, %s852_s13   ;;  %p1168_p8 = scmp.ne.s32.totalorder %s1159_s22, 0 }
  0x59   : > { %s574_s6 = sshll.u32 %s1060_s9, 7  ;;  %s208_s28 = scalar_lea.sflag [#allocation6], %s1060_s9 }
  0x5a   : > { %s1064_s29 = scalar_lea.vmem [#allocation5], %s574_s6 }
  0x5b   : > { %839 = dma.done.wait (%p1168_p8), %s208_s28, 2048  }
  0x5c   : > { %841 = vsyncadd (%p1168_p8), %s208_s28, 4294965248  ;;  %v701_v0 = vld [vmem:[%s1064_s29 + $0x40] sm:$0xff]   ;;  %v703_v2 = vld [vmem:[%s1064_s29 + $0x48] sm:$0xff]   ;;  %p238_p9 = scmp.lt.s32.totalorder %s860_s15, 1  ;;  %s575_s10 = sshll.u32 %s1060_s9, 4 }
  0x5d   : > { %v702_v1 = vld [vmem:[%s1064_s29] sm:$0xff]   ;;  %599 = vmatprep.subr.bf16.mxu0 %v701_v0  ;;  %v704_v3 = vld [vmem:[%s1064_s29 + $0x8] sm:$0xff]   ;;  %v705_v4 = vld [vmem:[%s1064_s29 + $0x50] sm:$0xff]   ;;  %s236_s11 = scalar_lea.vmem [#allocation7], %s575_s10  ;;  %s596_s4 = sshll.u32 %s860_s15, 7 }
  0x5e   : > { %600 = vmatpush3.bf16.msra.mxu0 %v702_v1  ;;  %v706_v5 = vld [vmem:[%s1064_s29 + $0x10] sm:$0xff]   ;;  %v707_v6 = vld [vmem:[%s1064_s29 + $0x58] sm:$0xff]   ;;  %v709_v8 = vld [vmem:[%s1064_s29 + $0x60] sm:$0xff]   ;;  %s239_s20 = scalar_select %p238_p9, %s860_s15, 1 }
  0x5f   : > { %601 = vmatprep.subr.bf16.mxu0 %v703_v2  ;;  %v708_v7 = vld [vmem:[%s1064_s29 + $0x18] sm:$0xff]   ;;  %v710_v9 = vld [vmem:[%s1064_s29 + $0x20] sm:$0xff]   ;;  %v711_v10 = vld [vmem:[%s1064_s29 + $0x68] sm:$0xff]   ;;  %s459_s21 = sshll.u32 %s236_s11, 4  ;;  %s1098_s7 = scalar_lea.hbm %s1150_s3, %s596_s4  ;;  %s1093_s21 = int_to_ptr.vmem [resolvable:$true] %s459_s21 }
  0x60   : > { %v719_v11 = vld [vmem:[#allocation2 + $0x4] ss:$8 sps:$4 sm:$0xff]   ;;  %v712_v12 = vld [vmem:[%s1064_s29 + $0x28] sm:$0xff]   ;;  %v717_v17 = vld [vmem:[#allocation2] ss:$8 sps:$4 sm:$0xff]   ;;  %s240_s18 = scalar_lea.vmem %s1149_s2, %s239_s20  ;;  %s444_s26 = scalar_lea.sflag [#allocation4], %s1060_s9 }
  0x61   : > { %422 = vmatprep.mubr.bf16.mxu0 %v719_v11  ;;  %v713_v13 = vld [vmem:[%s1064_s29 + $0x70] sm:$0xff]   ;;  %v715_v15 = vld [vmem:[%s1064_s29 + $0x78] sm:$0xff]   ;;  %s782_s8 = scalar_lea.vmem %s1093_s21, 256  ;;  %p1169_p13 = scmp.ne.s32.totalorder %s1160_s23, 0 }
  0x62   : > { %602 = vmatpush3.bf16.msra.mxu0 %v704_v3  ;;  %v714_v14 = vld [vmem:[%s1064_s29 + $0x30] sm:$0xff]   ;;  %v716_v16 = vld [vmem:[%s1064_s29 + $0x38] sm:$0xff]   ;;  %p783_p11 = scmp.ne.s32.totalorder %s1093_s21, %s782_s8  ;;  %s876_s15 = smov [#allocation7]  }
  0x63   : > { %603 = vmatprep.subr.bf16.mxu0 %v705_v4  ;;  %v576_v19 = vld [vmem:[%s240_s18] ss:$0 sm:$0xff]  ;;  %s786_s6 = sshll.u32 %s876_s15, 4  ;;  %s787_s6 = int_to_ptr.vmem [resolvable:$false] %s786_s6 }
  0x64   : > { %p784_p4 = pnand %p783_p11, %p1169_p13  ;;  %s788_s28 = scalar_lea.vmem %s787_s6, 512 }
  0x65   : > { %p789_p10 = scmp.lt.s32.totalorder %s1093_s21, %s787_s6  ;;  %p790_p3 = scmp.lt.s32.totalorder %s788_s28, %s782_s8 }
  0x66   : > { %604 = vmatpush3.bf16.msra.mxu0 %v706_v5  ;;  %p785_p1 = pneg %p784_p4 }
  0x67   : > { %605 = vmatprep.subr.bf16.mxu0 %v707_v6  ;;  %p791_p6 = por %p790_p3, %p789_p10 }
  0x69   : > { %p792_p0 = pnand %p791_p6, %p785_p1 }
  0x6a   : > { %606 = vmatpush3.bf16.msra.mxu0 %v708_v7 }
  0x6b   : > { %607 = vmatprep.subr.bf16.mxu0 %v709_v8 }
  0x6e   : > { %608 = vmatpush3.bf16.msra.mxu0 %v710_v9 }
  0x6f   : > { %609 = vmatprep.subr.bf16.mxu0 %v711_v10 }
  0x72   : > { %610 = vmatpush3.bf16.msra.mxu0 %v712_v12 }
  0x73   : > { %611 = vmatprep.subr.bf16.mxu0 %v713_v13 }
  0x76   : > { %612 = vmatpush3.bf16.msra.mxu0 %v714_v14 }
  0x77   : > { %613 = vmatprep.subr.bf16.mxu0 %v715_v15 }
  0x7a   : > { %614 = vmatpush3.bf16.msra.mxu0 %v716_v16 }
  0x7d   : > { %423 = vmatmul.mubr.bf16.vlgmr.msra.gmra.mrb[0].mxu0 %v717_v17 }
 0x150   : > { %v615_v18 = vpop.f32.mrb[0].mxu0 }
 0x151   : > { %v616_v20 = vpop.f32.mrb[1].mxu0 }
 0x152   : > { %v617_v21 = vadd.f32 %v616_v20, %v615_v18  ;;  %v618_v22 = vpop.f32.mrb[2].mxu0 }
 0x153   : > { %v619_v23 = vpop.f32.mrb[3].mxu0 }
 0x154   : > { %v425_v24 = vadd.f32 %v617_v21, %v576_v19  ;;  %v620_v25 = vadd.f32 %v619_v23, %v618_v22 }
 0x156   : > { %v433_v26 = vmul.f32 0.70710677, %v425_v24  ;;  %v428_v27 = vadd.f32 %v620_v25, %v576_v19  ;;  %v431_v30 = vmul.f32 0.5, %v425_v24 }
 0x158   : > { %720 = verf.f32 %v433_v26  ;;  %v434_v28 = vmul.f32 0.70710677, %v428_v27  ;;  %v432_v34 = vmul.f32 0.5, %v428_v27 }
 0x15a   : > { %722 = verf.f32 %v434_v28 }
 0x162   : > { %v721_v29 = vpop.eup %720 }
 0x163   : > { %v437_v31 = vadd.f32 1.0, %v721_v29 }
 0x164   : > { %v723_v32 = vpop.eup %722 }
 0x165   : > { %v439_v33 = vmul.f32 %v437_v31, %v431_v30  ;;  %v438_v35 = vadd.f32 1.0, %v723_v32 }
 0x167   : > { %441 = vst [vmem:[%s236_s11] sm:$0xff] %v439_v33  ;;  %v440_v36 = vmul.f32 %v438_v35, %v432_v34 }
 0x169   : > { %442 = vst [vmem:[%s236_s11 + $0x8] sm:$0xff] %v440_v36 }
 0x16a   : > { %795 = shalt.err (!%p792_p0)
}
 0x16b   : > { %s796_s29 = scalar_lea.hbm %s1098_s7, 256  ;;  %s800_s25 = scalar_lea.hbm %s1150_s3, 512 }
 0x16c   : > { %p797_p2 = scmp.ne.s32.totalorder %s1098_s7, %s796_s29  ;;  %p801_p5 = scmp.lt.u32.totalorder %s1098_s7, %s1150_s3 }
 0x16d   : > { %p802_p8 = scmp.lt.u32.totalorder %s800_s25, %s796_s29  ;;  %p804_p11 = scmp.lt.u32.totalorder %s796_s29, %s1098_s7 }
 0x16e   : > { %p798_p7 = pnand %p797_p2, %p1169_p13 }
 0x16f   : > { %p803_p9 = por %p802_p8, %p801_p5 }
 0x170   : > { %p799_p12 = pneg %p798_p7 }
 0x171   : > { %p805_p4 = por %p804_p11, %p803_p9 }
 0x173   : > { %p806_p1 = pnand %p805_p4, %p799_p12 }
 0x175   : > { %809 = shalt.err (!%p806_p1)
}
 0x176   : > { %s877_s11 = smov 128   ;;  %s878_s4 = smov 256  }
 0x177   : > { %s879_s5 = smov 8  }
 0x178   : > { %627 = dma.vmem_to_hbm [thread:$0]  (%p1169_p13), %s1093_s21, 256, %s1098_s7, %s444_s26, %s877_s11, %s878_s4, %s879_s5  }
 0x179 PF: > { %s474_s27 = sand.u32 1, %s848_s12   ;;  %p1170_p10 = scmp.ne.s32.totalorder %s1161_s24, 0 }
 0x17a   : > { %p1171_p3 = scmp.ge.s32.totalorder %s868_s17, 2  ;;  %s475_s8 = scalar_lea.sflag [#allocation4], %s474_s27 }
 0x17c   : > { %p638_p6 = pnand %p1171_p3, %p1170_p10 }
 0x17e   : > { %843 = dma.done.wait (!%p638_p6), %s475_s8, 256  }
 0x17f   : > { %845 = vsyncadd (!%p638_p6), %s475_s8, 4294967040  ;;  %s20_s17 = sadd.s32 1, %s868_s17   ;;  %s1172_s12 = smov %s852_s13 }
 0x180   : > { %p17_p0 = scmp.ge.s32.totalorder %s20_s17, 4   ;;  %s1173_s13 = smov %s856_s14 }
 0x181   : > { %s1174_s14 = smov %s1020_s19  ;;  %s1175_s15 = smov %s864_s16 }
 0x182   : > { %s1176_s16 = smov %s1178_s30  ;;  %19 = sbr.rel (!%p17_p0) target bundleno = 7 (0x7), region = 86 }
 0x189   :  { %480 = vsyncpa [#allocation3], 1 }
 0x18a   :  { %482 = vsyncpa [#allocation3 + $0x1], 1 }
 0x18b   :  { %483 = vsyncpa [#allocation6], 1 }
 0x18c   :  { %485 = vsyncpa [#allocation6 + $0x1], 1 }
 0x18d   :  { %486 = vsyncpa [#allocation4], 1 }
 0x18e   :  { %488 = vsyncpa [#allocation4 + $0x1], 1 }

</bundles_post_ra>
